<compile_context>
chip_gen: v7x
topology: tpu7x:2x2x1
jax: 0.10.0
libtpu: 0.0.40
codegen_flags: <defaults>
</compile_context>

<pallas_src>
import jax
import jax.numpy as jnp
from jax.experimental import pallas as pl
from jax.experimental.pallas import tpu as pltpu


def _mul_kernel(scale_ref, x_ref, o_ref):
    # scale lives in SMEM as a (1, 1) 32-bit scalar.  Cast the scalar once to the
    # output dtype and multiply the tile at its native width; the input->output
    # promotion (e.g. int32 -> f32) is fused into this same pass.
    s = scale_ref[0, 0].astype(o_ref.dtype)
    o_ref[...] = x_ref[...].astype(o_ref.dtype) * s


_LANE = 128
_COL_CANDIDATES = (2048, 1024, 512, 256, 128)   # lane-dense widths (multiples of 128)
_MIN_SPLIT_BYTES = 2 * 1024 * 1024              # split into >=2 tiles above this size


def _chip_tile_params():
    """Returns (target_tile_bytes, vmem_limit_bytes) chosen per TPU generation."""
    try:
        info = pltpu.get_tpu_info()
        vmem_cap = int(getattr(info, "vmem_capacity_bytes"))
    except Exception:
        vmem_cap = 64 << 20                     # conservative: assume v7x-sized VMEM
    if vmem_cap >= (100 << 20):
        # v5e / v6e: 128 MiB VMEM -> ~16 MiB tiles; double-buffered in+out ~64 MiB.
        return 16 << 20, 80 << 20
    # v7x: 64 MiB physical VMEM -> ~8 MiB tiles; double-buffered in+out ~32 MiB.
    return 8 << 20, 44 << 20


def mul_pallas(x, scale):
    """Elementwise y = x * scale via a Pallas TPU kernel (HBM-bandwidth bound)."""
    orig_shape = x.shape
    # torch-like promotion: int tensor * python float -> float32, bf16 stays bf16.
    out_dtype = jnp.result_type(x.dtype, scale)

    flat = x.reshape(-1)
    n = flat.shape[0]
    if n == 0:
        return jnp.zeros(orig_shape, out_dtype)

    # Runtime (1, 1) SMEM scalar: no recompile per scale value, no captured constant.
    scalar_dtype = jnp.float32 if jnp.issubdtype(out_dtype, jnp.floating) else jnp.int32
    scale_arr = jnp.full((1, 1), scale, dtype=scalar_dtype)
    scale_out = scale_arr[0, 0].astype(out_dtype)

    # 128-aligned bulk goes through the kernel; the (<128-element) tail is handled
    # with a trivial JAX multiply.  No whole-array jnp.pad / slice passes.
    bulk_n = (n // _LANE) * _LANE
    tail_n = n - bulk_n

    parts = []
    if bulk_n:
        cols = next(c for c in _COL_CANDIDATES if bulk_n % c == 0)
        rows = bulk_n // cols
        bulk = flat if tail_n == 0 else flat[:bulk_n]
        x2 = bulk.reshape(rows, cols)

        in_isz = jnp.dtype(x.dtype).itemsize
        out_isz = jnp.dtype(out_dtype).itemsize
        max_isz = max(in_isz, out_isz)
        # Row granularity keeping both input and output tiles on packed-sublane
        # boundaries: 8 (f32) / 16 (bf16) / 32 (int8).
        sublane = max(8, 32 // min(in_isz, out_isz))

        tile_bytes, vmem_limit = _chip_tile_params()
        tr = max(sublane, (tile_bytes // (cols * max_isz)) // sublane * sublane)

        if tr >= rows:
            # Whole array fits one tile.  If it is still reasonably large, split it
            # into 2 balanced tiles so both v7x TensorCores get work and the DMA
            # pipeline has >1 step to overlap.  Tiny arrays stay single-step.
            half = ((pl.cdiv(rows, 2) + sublane - 1) // sublane) * sublane
            if rows * cols * max_isz >= _MIN_SPLIT_BYTES and sublane <= half < rows:
                tr = half
            else:
                tr = rows                        # full extent on the row axis is legal
        grid_rows = pl.cdiv(rows, tr)            # ragged last block handled by Pallas masking

        out2 = pl.pallas_call(
            _mul_kernel,
            out_shape=jax.ShapeDtypeStruct((rows, cols), out_dtype),
            grid_spec=pltpu.PrefetchScalarGridSpec(
                num_scalar_prefetch=0,
                grid=(grid_rows,),
                in_specs=[
                    pl.BlockSpec(memory_space=pltpu.MemorySpace.SMEM),  # scale (1, 1)
                    pl.BlockSpec((tr, cols), lambda i: (i, 0)),
                ],
                out_specs=pl.BlockSpec((tr, cols), lambda i: (i, 0)),
            ),
            compiler_params=pltpu.CompilerParams(
                dimension_semantics=("parallel",),   # shards row tiles across TCs
                vmem_limit_bytes=vmem_limit,
            ),
        )(scale_arr, x2)
        parts.append(out2.reshape(-1))

    if tail_n:
        tail = flat[bulk_n:]
        parts.append(tail.astype(out_dtype) * scale_out)

    out = parts[0] if len(parts) == 1 else jnp.concatenate(parts)
    return out.reshape(orig_shape)


if __name__ == "__main__":
    key = jax.random.PRNGKey(0)

    # Small NCHW input consistent with the module's typical use.
    x = jax.random.normal(key, (2, 4, 16, 16), dtype=jnp.float32)
    scale = 0.5

    y = jax.block_until_ready(mul_pallas(x, scale))
    ref = x * scale
    assert y.shape == ref.shape and y.dtype == ref.dtype
    assert jnp.allclose(y, ref, atol=1e-6, rtol=1e-6)

    # Ragged element count (not a multiple of 128) + dtype-promotion path.
    xi = jax.random.randint(jax.random.PRNGKey(1), (4, 33), -10, 10, dtype=jnp.int32)
    yi = jax.block_until_ready(mul_pallas(xi, 1.5))
    refi = xi * 1.5
    assert yi.shape == refi.shape and yi.dtype == refi.dtype
    assert jnp.allclose(yi, refi, atol=1e-6, rtol=1e-6)

    print("KERNEL_OK")
</pallas_src>

<mosaic_0001>
module attributes {stable_mosaic.version = 11 : i64} {
  func.func @_mul_kernel(%arg0: i32, %arg1: memref<1x1xf32, #tpu.memory_space<smem>>, %arg2: memref<1x2048xf32, #tpu.memory_space<vmem>>, %arg3: memref<1x2048xf32, #tpu.memory_space<vmem>>) attributes {dimension_semantics = [#tpu.dimension_semantics<parallel>], iteration_bounds = array<i64: 1>, scalar_prefetch = 0 : i64, scratch_operands = 0 : i64, tpu.core_type = #tpu.core_type<tc>, window_params = [{transform_indices = @transform_0, window_bounds = array<i64: 1, 1>}, {transform_indices = @transform_1, window_bounds = array<i64: 1, 2048>}, {transform_indices = @transform_2, window_bounds = array<i64: 1, 2048>}]} {
    %c0 = arith.constant 0 : index
    %c0_0 = arith.constant 0 : index
    %0 = memref.load %arg1[%c0, %c0_0] : memref<1x1xf32, #tpu.memory_space<smem>>
    %c0_1 = arith.constant 0 : index
    %c0_2 = arith.constant 0 : index
    %1 = vector.load %arg2[%c0_1, %c0_2] : memref<1x2048xf32, #tpu.memory_space<vmem>>, vector<1x2048xf32>
    %2 = vector.broadcast %0 : f32 to vector<1x2048xf32>
    %3 = arith.mulf %1, %2 : vector<1x2048xf32>
    %c0_3 = arith.constant 0 : index
    %c0_4 = arith.constant 0 : index
    %4 = vector.load %arg3[%c0_3, %c0_4] : memref<1x2048xf32, #tpu.memory_space<vmem>>, vector<1x2048xf32>
    tpu.vector_store %arg3[%c0_3, %c0_4], %3 {strides = array<i32>} : memref<1x2048xf32, #tpu.memory_space<vmem>>, vector<1x2048xf32>,
    return
  }
  func.func @transform_0(%arg0: i32) -> (i32, i32) {
    %c0_i32 = arith.constant 0 : i32
    %c0_i32_0 = arith.constant 0 : i32
    %c0_i32_1 = arith.constant 0 : i32
    return %c0_i32, %c0_i32_0 : i32, i32
  }
  func.func @transform_1(%arg0: i32) -> (i32, i32) {
    %c0_i32 = arith.constant 0 : i32
    %c0_i32_0 = arith.constant 0 : i32
    return %arg0, %c0_i32 : i32, i32
  }
  func.func @transform_2(%arg0: i32) -> (i32, i32) {
    %c0_i32 = arith.constant 0 : i32
    %c0_i32_0 = arith.constant 0 : i32
    return %arg0, %c0_i32 : i32, i32
  }
}

</mosaic_0001>

<bundles_post_ra>
// kernel: tpu_custom_call.1
= control target key start
LH: loop header
LB: loop body
LE: loop exit
PB: predicated region body
PF: predicated region fallthrough
CT: control target
= control target key end

     0   :  { %8 = vsyncpa [#allocation4], 0  ;;  %s142_s0 = inlined_call_operand.<no memory space> [shape: f32[1,1], index: 0, kind: input, shape index: {}]   ;;  %s143_s1 = inlined_call_operand.hbm [shape: f32[1,2048], index: 1, kind: input, shape index: {}]   ;;  %s144_s2 = inlined_call_operand.hbm [shape: f32[1,2048], index: 2, kind: output, shape index: {}]  }
   0x1   :  { %9 = vsyncpa [#allocation5], 0  ;;  %s98_s9 = smov [#allocation3]   ;;  %s50_s13 = scalar_lea.hbm %s143_s1, 256 }
   0x2   :  { %s18_s10 = sshll.u32 %s98_s9, 4  ;;  %p51_p0 = scmp.ne.s32.totalorder %s143_s1, %s50_s13  ;;  %s19_s10 = int_to_ptr.vmem [resolvable:$true] %s18_s10 }
   0x3   :  { %p54_p1 = scmp.lt.u32.totalorder %s50_s13, %s143_s1 }
   0x5   :  { %p56_p2 = pnand %p54_p1, %p51_p0 }
   0x7   :  { %59 = shalt.err (!%p56_p2)
}
   0x8   :  { %s60_s18 = scalar_lea.vmem %s19_s10, 256  ;;  %p65_p4 = scmp.lt.s32.totalorder %s19_s10, %s19_s10 }
   0x9   :  { %p61_p3 = scmp.ne.s32.totalorder %s19_s10, %s60_s18  ;;  %p66_p5 = scmp.lt.s32.totalorder %s60_s18, %s60_s18 }
   0xb   :  { %p67_p6 = por %p66_p5, %p65_p4 }
   0xd   :  { %p68_p7 = pnand %p67_p6, %p61_p3 }
   0xf   :  { %71 = shalt.err (!%p68_p7)
}
  0x10   :  { %21 = dma.hbm_to_vmem [thread:$0]  %s143_s1, 256, %s19_s10, [#allocation4]  }
  0x11   :  { %94 = dma.done.wait [#allocation4], 256  }
  0x12   :  { %95 = vsyncadd [#allocation4], 4294967040  ;;  %v28_v0 = vstv %s142_s0  ;;  %s99_s23 = smov [#allocation6]   ;;  %v26_v1 = vld [vmem:[#allocation3] sm:$0xff]  ;;  %v27_v2 = vld [vmem:[#allocation3 + $0x8] sm:$0xff] }
  0x13   :  { %s39_s24 = sshll.u32 %s99_s23, 4  ;;  %v29_v3 = vmul.f32 %v28_v0, %v26_v1  ;;  %v30_v4 = vmul.f32 %v28_v0, %v27_v2  ;;  %s40_s24 = int_to_ptr.vmem [resolvable:$true] %s39_s24 }
  0x14   :  { %s72_s25 = scalar_lea.vmem %s40_s24, 256  ;;  %p77_p9 = scmp.lt.s32.totalorder %s40_s24, %s40_s24 }
  0x15   :  { %31 = vst [vmem:[#allocation6] sm:$0xff] %v29_v3  ;;  %32 = vst [vmem:[#allocation6 + $0x8] sm:$0xff] %v30_v4  ;;  %p73_p8 = scmp.ne.s32.totalorder %s40_s24, %s72_s25  ;;  %p78_p10 = scmp.lt.s32.totalorder %s72_s25, %s72_s25 }
  0x17   :  { %p79_p11 = por %p78_p10, %p77_p9 }
  0x19   :  { %p80_p12 = pnand %p79_p11, %p73_p8 }
  0x1b   :  { %83 = shalt.err (!%p80_p12)
}
  0x1c   :  { %s84_s0 = scalar_lea.hbm %s144_s2, 256 }
  0x1d   :  { %p85_p13 = scmp.ne.s32.totalorder %s144_s2, %s84_s0  ;;  %p88_p0 = scmp.lt.u32.totalorder %s84_s0, %s144_s2 }
  0x1f   :  { %p90_p1 = pnand %p88_p0, %p85_p13 }
  0x21   :  { %93 = shalt.err (!%p90_p1)
}
  0x22   :  { %42 = dma.vmem_to_hbm [thread:$0]  %s40_s24, 256, %s144_s2, [#allocation5]  }
  0x23   :  { %96 = dma.done.wait [#allocation5], 256  }
  0x24   :  { %97 = vsyncadd [#allocation5], 4294967040 }
  0x25   :  { %46 = vsyncpa [#allocation4], 1 }
  0x26   :  { %47 = vsyncpa [#allocation5], 1 }

</bundles_post_ra>
